<compile_context>
chip_gen: v7x
topology: tpu7x:2x2x1
jax: 0.10.0
libtpu: 0.0.40
codegen_flags: <defaults>
</compile_context>

<pallas_src>
from functools import partial

import jax
import jax.numpy as jnp
from jax.experimental import pallas as pl
from jax.experimental.pallas import tpu as pltpu


def _round_up(x, m):
    return (x + m - 1) // m * m


def _vmem_limit_bytes():
    # Size the scoped VMEM limit from the hardware (v5e/v6e: 128 MiB physical,
    # v7x: 64 MiB).  Conservative 3/4 of physical, capped at 96 MiB.
    try:
        cap = int(pltpu.get_tpu_info().vmem_capacity_bytes)
    except Exception:
        cap = 64 * 1024 * 1024
    return min(96 * 1024 * 1024, cap * 3 // 4)


# --------------------------------------------------------------------------
# Kernel 1: masked, label-smoothed cross-entropy partial sums.
# Grid = (row tiles, vocab chunks); per-row online-softmax state lives in
# (tm, 1) VMEM scratch; [sum_loss, count] accumulate into lanes 0/1 of a
# resident (8, 128) output block (written only at the vocab-finalize step).
# --------------------------------------------------------------------------
def _ce_kernel(logits_ref, labels_ref, out_ref, m_ref, l_ref, s_ref, g_ref, *,
               n_rows, tm, vocab_size, vc, nv, eps, mask_cols, mask_rows):
    ri = pl.program_id(0)
    vj = pl.program_id(1)

    @pl.when((ri == 0) & (vj == 0))
    def _init_out():
        out_ref[...] = jnp.zeros_like(out_ref)

    @pl.when(vj == 0)
    def _init_row_state():
        m_ref[...] = jnp.full(m_ref.shape, -jnp.inf, m_ref.dtype)
        l_ref[...] = jnp.zeros_like(l_ref)
        s_ref[...] = jnp.zeros_like(s_ref)
        g_ref[...] = jnp.zeros_like(g_ref)

    x = logits_ref[...].astype(jnp.float32)              # (tm, vc), native->f32
    labels = labels_ref[...]                             # (tm, 1) int32, -1 = drop

    col = jax.lax.broadcasted_iota(jnp.int32, x.shape, 1)
    if nv > 1:
        col = col + vj * vc                              # global vocab index

    if mask_cols:                                        # last chunk overhangs V
        valid = col < vocab_size
        x_max = jnp.where(valid, x, -jnp.inf)            # exp(-inf)==0: no 2nd select
        x_sum = jnp.where(valid, x, 0.0)
    else:
        x_max = x
        x_sum = x

    # online-softmax update (per-row running state)
    m_old = m_ref[...]
    m_new = jnp.maximum(m_old, jnp.max(x_max, axis=1, keepdims=True))
    alpha = jnp.exp(m_old - m_new)
    p_sum = jnp.sum(jnp.exp(x_max - m_new), axis=1, keepdims=True)
    l_ref[...] = alpha * l_ref[...] + p_sum
    m_ref[...] = m_new
    s_ref[...] = s_ref[...] + jnp.sum(x_sum, axis=1, keepdims=True)
    # gather logits[label] via one-hot compare (no dynamic gather on TPU)
    g_ref[...] = g_ref[...] + jnp.sum(jnp.where(col == labels, x, 0.0),
                                      axis=1, keepdims=True)

    @pl.when(vj == nv - 1)
    def _finalize():
        lse = m_ref[...] + jnp.log(l_ref[...])           # (tm, 1)
        nll = lse - g_ref[...]
        smooth = lse - s_ref[...] * (1.0 / vocab_size)
        loss_i = (1.0 - eps) * nll + eps * smooth
        keep = (labels >= 0).astype(jnp.float32)
        if mask_rows:                                    # last row tile overhangs n
            row = jax.lax.broadcasted_iota(jnp.int32, keep.shape, 0) + ri * tm
            in_range = row < n_rows
            keep = jnp.where(in_range, keep, 0.0)
            loss_i = jnp.where(in_range, loss_i, 0.0)    # select kills OOB NaN/Inf
        part_loss = jnp.sum(loss_i * keep)
        part_cnt = jnp.sum(keep)
        lane = jax.lax.broadcasted_iota(jnp.int32, out_ref.shape, 1)
        out_ref[...] += jnp.where(lane == 0, part_loss,
                                  jnp.where(lane == 1, part_cnt, 0.0))


def _masked_smoothed_ce_sums(logits2d, labels2d, vocab_size, eps):
    """Returns (sum of smoothed CE over kept tokens, kept-token count)."""
    n, v = logits2d.shape
    itemsize = jnp.dtype(logits2d.dtype).itemsize

    # Vocab chunking: small vocabs use one full-V block (allowed even when
    # V % 128 != 0); large vocabs use 2048-lane chunks + online softmax.
    vc_max = 2048
    if v <= vc_max:
        vc, nv, mask_cols = v, 1, False
    else:
        vc = vc_max
        nv = pl.cdiv(v, vc)
        mask_cols = (v % vc) != 0

    # Row tile sized against a ~2 MiB native-dtype logits block so that
    # 2x double-buffer + f32 temporaries fit scoped VMEM on all generations.
    budget = 2 * 1024 * 1024
    tm = max(8, min(512, (budget // (vc * itemsize)) // 8 * 8))
    tm = min(tm, _round_up(n, 8))
    nr = pl.cdiv(n, tm)
    mask_rows = (n % tm) != 0

    cost = pl.CostEstimate(
        flops=int(8 * n * v),
        transcendentals=int(n * v + n),
        bytes_accessed=int(n * v * itemsize + n * 4 + 8 * 128 * 4),
    )

    out = pl.pallas_call(
        partial(_ce_kernel, n_rows=n, tm=tm, vocab_size=v, vc=vc, nv=nv,
                eps=float(eps), mask_cols=mask_cols, mask_rows=mask_rows),
        out_shape=jax.ShapeDtypeStruct((8, 128), jnp.float32),
        grid=(nr, nv),
        in_specs=[
            pl.BlockSpec((tm, vc), lambda ri, vj: (ri, vj)),
            pl.BlockSpec((tm, 1), lambda ri, vj: (ri, 0)),
        ],
        out_specs=pl.BlockSpec((8, 128), lambda ri, vj: (0, 0)),
        scratch_shapes=[pltpu.VMEM((tm, 1), jnp.float32)] * 4,
        compiler_params=pltpu.CompilerParams(
            dimension_semantics=("arbitrary", "arbitrary"),
            vmem_limit_bytes=_vmem_limit_bytes()),
        cost_estimate=cost,
    )(logits2d, labels2d)
    return out[0, 0], out[0, 1]


# --------------------------------------------------------------------------
# Kernel 2: sum of squared errors (used only for LARGE coordinate tensors).
# --------------------------------------------------------------------------
def _sse_kernel(a_ref, b_ref, out_ref, *, n_rows, tr, mask_rows):
    i = pl.program_id(0)

    @pl.when(i == 0)
    def _init():
        out_ref[...] = jnp.zeros_like(out_ref)

    d = a_ref[...].astype(jnp.float32) - b_ref[...].astype(jnp.float32)
    d2 = d * d
    if mask_rows:                                        # last tile overhangs rows
        row = jax.lax.broadcasted_iota(jnp.int32, d2.shape, 0) + i * tr
        d2 = jnp.where(row < n_rows, d2, 0.0)            # select kills OOB garbage
    part = jnp.sum(d2)
    lane = jax.lax.broadcasted_iota(jnp.int32, out_ref.shape, 1)
    out_ref[...] += jnp.where(lane == 0, part, 0.0)


def _sum_squared_error(a, b):
    t = int(a.size)
    af = a.reshape(-1)
    bf = b.reshape(-1)
    rows = pl.cdiv(t, 128)
    if t % 128 != 0:
        # TODO(synk): tail pad copies the stream once; only hit when numel is
        # not a multiple of 128.
        pad = rows * 128 - t
        af = jnp.pad(af, (0, pad))
        bf = jnp.pad(bf, (0, pad))
    a2 = af.reshape(rows, 128)
    b2 = bf.reshape(rows, 128)

    tr = max(8, min(1024, _round_up(rows, 8)))           # >=512 KiB f32 blocks
    nr = pl.cdiv(rows, tr)
    mask_rows = (rows % tr) != 0
    itemsize = jnp.dtype(a.dtype).itemsize

    out = pl.pallas_call(
        partial(_sse_kernel, n_rows=rows, tr=tr, mask_rows=mask_rows),
        out_shape=jax.ShapeDtypeStruct((8, 128), jnp.float32),
        grid=(nr,),
        in_specs=[pl.BlockSpec((tr, 128), lambda i: (i, 0)),
                  pl.BlockSpec((tr, 128), lambda i: (i, 0))],
        out_specs=pl.BlockSpec((8, 128), lambda i: (0, 0)),
        compiler_params=pltpu.CompilerParams(
            dimension_semantics=("arbitrary",),
            vmem_limit_bytes=_vmem_limit_bytes()),
        cost_estimate=pl.CostEstimate(
            flops=int(3 * t), transcendentals=0,
            bytes_accessed=int(2 * t * itemsize + 8 * 128 * 4)),
    )(a2, b2)
    return out[0, 0]


_SSE_PALLAS_MIN_ELEMS = 1 << 16   # below this, a pallas_call costs more than the math


# --------------------------------------------------------------------------
# Wrapper with the CrystalCriterions.forward semantics.
# --------------------------------------------------------------------------
@partial(jax.jit, static_argnames=("label_smoothing",))
def crystal_criterions_forward(word_logits, y_0, label_ids, label_coordinates,
                               coordinates_mask, *, label_smoothing=0.05):
    B, S, V = word_logits.shape

    # Feed the FULL logits (free contiguous reshape, no [:, :-1, :] copy) and
    # apply the next-token shift only to the small label/mask arrays: position
    # t uses label_ids[:, t+1]; the last position of every sequence is dropped.
    logits2d = word_logits.reshape(B * S, V)

    labels_next = jnp.concatenate(
        [label_ids[:, 1:].astype(jnp.int32),
         jnp.full((B, 1), -1, jnp.int32)], axis=1)                 # (B, S)
    mask_next = jnp.concatenate(
        [coordinates_mask[:, 1:].astype(jnp.int32),
         jnp.ones((B, 1), jnp.int32)], axis=1)                     # (B, S)
    keep = jnp.logical_and(mask_next == 0, labels_next != -100)    # ignore_index
    # fold keep into the label stream: sentinel -1 means "drop this token"
    labels_eff = jnp.where(keep, labels_next, -1).reshape(B * S, 1)

    loss_sum, count = _masked_smoothed_ce_sums(
        logits2d, labels_eff, V, label_smoothing)
    loss_words = loss_sum / count          # count==0 -> NaN, same as torch

    # MSE over coordinates (torch casts labels to y_0 dtype first).
    lc = label_coordinates.astype(y_0.dtype)
    if y_0.size <= _SSE_PALLAS_MIN_ELEMS:
        loss_coord = jnp.mean((y_0.astype(jnp.float32)
                               - lc.astype(jnp.float32)) ** 2)
    else:
        loss_coord = _sum_squared_error(y_0, lc) / y_0.size

    loss = loss_words + loss_coord
    # TODO(synk): the torch module's .item()-based loss_log dict and the
    # in-place mutation of model_output are host-side bookkeeping; we return
    # the scalar losses instead.
    return loss, loss_words, loss_coord


# --------------------------------------------------------------------------
# Self-test
# --------------------------------------------------------------------------
if __name__ == "__main__":
    EPS = 0.05

    def reference(word_logits, y_0, label_ids, label_coordinates, coordinates_mask):
        sl = word_logits[:, :-1, :].astype(jnp.float32)
        lab = label_ids[:, 1:].astype(jnp.int32)
        msk = coordinates_mask[:, 1:].astype(jnp.int32)
        keep = jnp.logical_and(msk == 0, lab != -100).astype(jnp.float32)
        logp = jax.nn.log_softmax(sl, axis=-1)
        lab_safe = jnp.clip(lab, 0, sl.shape[-1] - 1)
        nll = -jnp.take_along_axis(logp, lab_safe[..., None], axis=-1)[..., 0]
        smooth = -jnp.mean(logp, axis=-1)
        per = (1.0 - EPS) * nll + EPS * smooth
        ref_words = jnp.sum(per * keep) / jnp.sum(keep)
        ref_coord = jnp.mean((y_0.astype(jnp.float32)
                              - label_coordinates.astype(jnp.float32)) ** 2)
        return ref_words + ref_coord, ref_words, ref_coord

    def check(name, got, want, atol, rtol):
        got = jax.block_until_ready(got)
        assert jnp.allclose(got, want, atol=atol, rtol=rtol), (name, got, want)

    # --- test 1: small f32 case (single vocab chunk, exercises ignore_index) ---
    key = jax.random.PRNGKey(0)
    k1, k2, k3, k4 = jax.random.split(key, 4)
    bs, seq, vocab = 2, 8, 32
    word_logits = jax.random.normal(k1, (bs, seq, vocab), jnp.float32)
    label_ids = jax.random.randint(k2, (bs, seq), 0, vocab, jnp.int32)
    label_ids = label_ids.at[0, 2].set(-100)        # exercise ignore_index path
    coordinates_mask = jnp.tile((jnp.arange(seq) % 3 == 0).astype(jnp.int32), (bs, 1))
    y_0 = jax.random.normal(k3, (bs, seq, 3), jnp.float32)
    label_coordinates = jax.random.normal(k4, (bs, seq, 3), jnp.float32)

    loss, lw, lc = crystal_criterions_forward(
        word_logits, y_0, label_ids, label_coordinates, coordinates_mask)
    r_loss, r_lw, r_lc = reference(
        word_logits, y_0, label_ids, label_coordinates, coordinates_mask)
    check("t1.loss_words", lw, r_lw, 1e-5, 1e-5)
    check("t1.loss_coord", lc, r_lc, 1e-5, 1e-5)
    check("t1.loss", loss, r_loss, 1e-5, 1e-5)

    # --- test 2: bf16 logits, multi-chunk vocab, partial row & vocab tiles ---
    k5, k6, k7, k8 = jax.random.split(jax.random.PRNGKey(1), 4)
    bs2, seq2, vocab2 = 3, 7, 2500
    wl2 = jax.random.normal(k5, (bs2, seq2, vocab2), jnp.float32).astype(jnp.bfloat16)
    li2 = jax.random.randint(k6, (bs2, seq2), 0, vocab2, jnp.int32)
    cm2 = jnp.tile((jnp.arange(seq2) % 2 == 0).astype(jnp.int32), (bs2, 1))
    y2 = jax.random.normal(k7, (bs2, seq2, 3), jnp.float32)
    lc2 = jax.random.normal(k8, (bs2, seq2, 3), jnp.float32)

    loss2, lw2, lcd2 = crystal_criterions_forward(wl2, y2, li2, lc2, cm2)
    r2_loss, r2_lw, r2_lc = reference(wl2, y2, li2, lc2, cm2)
    check("t2.loss_words", lw2, r2_lw, 1e-3, 1e-3)
    check("t2.loss_coord", lcd2, r2_lc, 1e-5, 1e-5)
    check("t2.loss", loss2, r2_loss, 1e-3, 1e-3)

    # --- test 3: standalone Pallas SSE path (large coordinate tensor) ---
    ka, kb = jax.random.split(jax.random.PRNGKey(2))
    a_big = jax.random.normal(ka, (1100, 77), jnp.float32)
    b_big = jax.random.normal(kb, (1100, 77), jnp.float32)
    sse = jax.block_until_ready(_sum_squared_error(a_big, b_big))
    sse_ref = jnp.sum((a_big - b_big) ** 2)
    assert jnp.allclose(sse, sse_ref, atol=1e-2, rtol=1e-4), (sse, sse_ref)

    print("KERNEL_OK")
</pallas_src>

<mosaic_0001>
module attributes {stable_mosaic.version = 11 : i64} {
  func.func @_ce_kernel(%arg0: i32, %arg1: i32, %arg2: memref<16x32xf32, #tpu.memory_space<vmem>>, %arg3: memref<16x1xi32, #tpu.memory_space<vmem>>, %arg4: memref<8x128xf32, #tpu.memory_space<vmem>>, %arg5: memref<16x1xf32, #tpu.memory_space<vmem>>, %arg6: memref<16x1xf32, #tpu.memory_space<vmem>>, %arg7: memref<16x1xf32, #tpu.memory_space<vmem>>, %arg8: memref<16x1xf32, #tpu.memory_space<vmem>>) attributes {dimension_semantics = [#tpu.dimension_semantics<arbitrary>, #tpu.dimension_semantics<arbitrary>], iteration_bounds = array<i64: 1, 1>, scalar_prefetch = 0 : i64, scratch_operands = 4 : i64, tpu.core_type = #tpu.core_type<tc>, window_params = [{transform_indices = @transform_0, window_bounds = array<i64: 16, 32>}, {transform_indices = @transform_1, window_bounds = array<i64: 16, 1>}, {pipeline_mode = #tpu.pipeline_mode<synchronous>, transform_indices = @transform_2, window_bounds = array<i64: 8, 128>}]} {
    %c0_i32 = arith.constant 0 : i32
    %0 = arith.cmpi eq, %arg0, %c0_i32 : i32
    %c0_i32_0 = arith.constant 0 : i32
    %1 = arith.cmpi eq, %arg1, %c0_i32_0 : i32
    %2 = arith.andi %0, %1 : i1
    %3 = arith.extui %2 : i1 to i32
    %c0_i32_1 = arith.constant 0 : i32
    %4 = arith.cmpi ne, %3, %c0_i32_1 : i32
    scf.if %4 {
      %cst_29 = arith.constant 0.000000e+00 : f32
      %44 = vector.broadcast %cst_29 : f32 to vector<8x128xf32>
      %c0_30 = arith.constant 0 : index
      %c0_31 = arith.constant 0 : index
      %45 = vector.load %arg4[%c0_30, %c0_31] : memref<8x128xf32, #tpu.memory_space<vmem>>, vector<8x128xf32>
      tpu.vector_store %arg4[%c0_30, %c0_31], %44 {strides = array<i32>} : memref<8x128xf32, #tpu.memory_space<vmem>>, vector<8x128xf32>,
    } else {
    }
    %c0_i32_2 = arith.constant 0 : i32
    %5 = arith.cmpi eq, %arg1, %c0_i32_2 : i32
    %6 = arith.extui %5 : i1 to i32
    %c0_i32_3 = arith.constant 0 : i32
    %7 = arith.cmpi ne, %6, %c0_i32_3 : i32
    scf.if %7 {
      %cst_29 = arith.constant 0xFF800000 : f32
      %44 = vector.broadcast %cst_29 : f32 to vector<16x1xf32>
      %c0_30 = arith.constant 0 : index
      %c0_31 = arith.constant 0 : index
      %45 = vector.load %arg5[%c0_30, %c0_31] : memref<16x1xf32, #tpu.memory_space<vmem>>, vector<16x1xf32>
      tpu.vector_store %arg5[%c0_30, %c0_31], %44 {strides = array<i32>} : memref<16x1xf32, #tpu.memory_space<vmem>>, vector<16x1xf32>,
      %cst_32 = arith.constant 0.000000e+00 : f32
      %46 = vector.broadcast %cst_32 : f32 to vector<16x1xf32>
      %c0_33 = arith.constant 0 : index
      %c0_34 = arith.constant 0 : index
      %47 = vector.load %arg6[%c0_33, %c0_34] : memref<16x1xf32, #tpu.memory_space<vmem>>, vector<16x1xf32>
      tpu.vector_store %arg6[%c0_33, %c0_34], %46 {strides = array<i32>} : memref<16x1xf32, #tpu.memory_space<vmem>>, vector<16x1xf32>,
      %cst_35 = arith.constant 0.000000e+00 : f32
      %48 = vector.broadcast %cst_35 : f32 to vector<16x1xf32>
      %c0_36 = arith.constant 0 : index
      %c0_37 = arith.constant 0 : index
      %49 = vector.load %arg7[%c0_36, %c0_37] : memref<16x1xf32, #tpu.memory_space<vmem>>, vector<16x1xf32>
      tpu.vector_store %arg7[%c0_36, %c0_37], %48 {strides = array<i32>} : memref<16x1xf32, #tpu.memory_space<vmem>>, vector<16x1xf32>,
      %cst_38 = arith.constant 0.000000e+00 : f32
      %50 = vector.broadcast %cst_38 : f32 to vector<16x1xf32>
      %c0_39 = arith.constant 0 : index
      %c0_40 = arith.constant 0 : index
      %51 = vector.load %arg8[%c0_39, %c0_40] : memref<16x1xf32, #tpu.memory_space<vmem>>, vector<16x1xf32>
      tpu.vector_store %arg8[%c0_39, %c0_40], %50 {strides = array<i32>} : memref<16x1xf32, #tpu.memory_space<vmem>>, vector<16x1xf32>,
    } else {
    }
    %c0 = arith.constant 0 : index
    %c0_4 = arith.constant 0 : index
    %8 = vector.load %arg2[%c0, %c0_4] : memref<16x32xf32, #tpu.memory_space<vmem>>, vector<16x32xf32>
    %c0_5 = arith.constant 0 : index
    %c0_6 = arith.constant 0 : index
    %9 = vector.load %arg3[%c0_5, %c0_6] : memref<16x1xi32, #tpu.memory_space<vmem>>, vector<16x1xi32>
    %10 = tpu.iota {dimensions = array<i32: 1>} : vector<16x32xi32>
    %c0_7 = arith.constant 0 : index
    %c0_8 = arith.constant 0 : index
    %11 = vector.load %arg5[%c0_7, %c0_8] : memref<16x1xf32, #tpu.memory_space<vmem>>, vector<16x1xf32>
    %cst = arith.constant dense<0xFF800000> : vector<16xf32>
    %12 = vector.multi_reduction <maximumf>, %8, %cst [1] : vector<16x32xf32> to vector<16xf32>
    %13 = vector.shape_cast %12 : vector<16xf32> to vector<16x1xf32>
    %14 = arith.maximumf %11, %13 : vector<16x1xf32>
    %15 = arith.subf %11, %14 : vector<16x1xf32>
    %16 = math.exp %15 : vector<16x1xf32>
    %17 = vector.broadcast %14 : vector<16x1xf32> to vector<16x32xf32>
    %18 = arith.subf %8, %17 : vector<16x32xf32>
    %19 = math.exp %18 : vector<16x32xf32>
    %cst_9 = arith.constant dense<0.000000e+00> : vector<16xf32>
    %20 = vector.multi_reduction <add>, %19, %cst_9 [1] : vector<16x32xf32> to vector<16xf32>
    %21 = vector.shape_cast %20 : vector<16xf32> to vector<16x1xf32>
    %c0_10 = arith.constant 0 : index
    %c0_11 = arith.constant 0 : index
    %22 = vector.load %arg6[%c0_10, %c0_11] : memref<16x1xf32, #tpu.memory_space<vmem>>, vector<16x1xf32>
    %23 = arith.mulf %16, %22 : vector<16x1xf32>
    %24 = arith.addf %23, %21 : vector<16x1xf32>
    %c0_12 = arith.constant 0 : index
    %c0_13 = arith.constant 0 : index
    %25 = vector.load %arg6[%c0_12, %c0_13] : memref<16x1xf32, #tpu.memory_space<vmem>>, vector<16x1xf32>
    tpu.vector_store %arg6[%c0_12, %c0_13], %24 {strides = array<i32>} : memref<16x1xf32, #tpu.memory_space<vmem>>, vector<16x1xf32>,
    %c0_14 = arith.constant 0 : index
    %c0_15 = arith.constant 0 : index
    %26 = vector.load %arg5[%c0_14, %c0_15] : memref<16x1xf32, #tpu.memory_space<vmem>>, vector<16x1xf32>
    tpu.vector_store %arg5[%c0_14, %c0_15], %14 {strides = array<i32>} : memref<16x1xf32, #tpu.memory_space<vmem>>, vector<16x1xf32>,
    %c0_16 = arith.constant 0 : index
    %c0_17 = arith.constant 0 : index
    %27 = vector.load %arg7[%c0_16, %c0_17] : memref<16x1xf32, #tpu.memory_space<vmem>>, vector<16x1xf32>
    %cst_18 = arith.constant dense<0.000000e+00> : vector<16xf32>
    %28 = vector.multi_reduction <add>, %8, %cst_18 [1] : vector<16x32xf32> to vector<16xf32>
    %29 = vector.shape_cast %28 : vector<16xf32> to vector<16x1xf32>
    %30 = arith.addf %27, %29 : vector<16x1xf32>
    %c0_19 = arith.constant 0 : index
    %c0_20 = arith.constant 0 : index
    %31 = vector.load %arg7[%c0_19, %c0_20] : memref<16x1xf32, #tpu.memory_space<vmem>>, vector<16x1xf32>
    tpu.vector_store %arg7[%c0_19, %c0_20], %30 {strides = array<i32>} : memref<16x1xf32, #tpu.memory_space<vmem>>, vector<16x1xf32>,
    %c0_21 = arith.constant 0 : index
    %c0_22 = arith.constant 0 : index
    %32 = vector.load %arg8[%c0_21, %c0_22] : memref<16x1xf32, #tpu.memory_space<vmem>>, vector<16x1xf32>
    %33 = vector.broadcast %9 : vector<16x1xi32> to vector<16x32xi32>
    %34 = arith.cmpi eq, %10, %33 : vector<16x32xi32>
    %cst_23 = arith.constant 0.000000e+00 : f32
    %35 = vector.broadcast %cst_23 : f32 to vector<16x32xf32>
    %36 = arith.select %34, %8, %35 : vector<16x32xi1>, vector<16x32xf32>
    %cst_24 = arith.constant dense<0.000000e+00> : vector<16xf32>
    %37 = vector.multi_reduction <add>, %36, %cst_24 [1] : vector<16x32xf32> to vector<16xf32>
    %38 = vector.shape_cast %37 : vector<16xf32> to vector<16x1xf32>
    %39 = arith.addf %32, %38 : vector<16x1xf32>
    %c0_25 = arith.constant 0 : index
    %c0_26 = arith.constant 0 : index
    %40 = vector.load %arg8[%c0_25, %c0_26] : memref<16x1xf32, #tpu.memory_space<vmem>>, vector<16x1xf32>
    tpu.vector_store %arg8[%c0_25, %c0_26], %39 {strides = array<i32>} : memref<16x1xf32, #tpu.memory_space<vmem>>, vector<16x1xf32>,
    %c0_i32_27 = arith.constant 0 : i32
    %41 = arith.cmpi eq, %arg1, %c0_i32_27 : i32
    %42 = arith.extui %41 : i1 to i32
    %c0_i32_28 = arith.constant 0 : i32
    %43 = arith.cmpi ne, %42, %c0_i32_28 : i32
    scf.if %43 {
      %c0_29 = arith.constant 0 : index
      %c0_30 = arith.constant 0 : index
      %44 = vector.load %arg5[%c0_29, %c0_30] : memref<16x1xf32, #tpu.memory_space<vmem>>, vector<16x1xf32>
      %c0_31 = arith.constant 0 : index
      %c0_32 = arith.constant 0 : index
      %45 = vector.load %arg6[%c0_31, %c0_32] : memref<16x1xf32, #tpu.memory_space<vmem>>, vector<16x1xf32>
      %46 = math.log %45 : vector<16x1xf32>
      %47 = arith.addf %44, %46 : vector<16x1xf32>
      %c0_33 = arith.constant 0 : index
      %c0_34 = arith.constant 0 : index
      %48 = vector.load %arg8[%c0_33, %c0_34] : memref<16x1xf32, #tpu.memory_space<vmem>>, vector<16x1xf32>
      %49 = arith.subf %47, %48 : vector<16x1xf32>
      %c0_35 = arith.constant 0 : index
      %c0_36 = arith.constant 0 : index
      %50 = vector.load %arg7[%c0_35, %c0_36] : memref<16x1xf32, #tpu.memory_space<vmem>>, vector<16x1xf32>
      %cst_37 = arith.constant 3.125000e-02 : f32
      %51 = vector.broadcast %cst_37 : f32 to vector<16x1xf32>
      %52 = arith.mulf %50, %51 : vector<16x1xf32>
      %53 = arith.subf %47, %52 : vector<16x1xf32>
      %cst_38 = arith.constant 0.949999988 : f32
      %54 = vector.broadcast %cst_38 : f32 to vector<16x1xf32>
      %55 = arith.mulf %54, %49 : vector<16x1xf32>
      %cst_39 = arith.constant 5.000000e-02 : f32
      %56 = vector.broadcast %cst_39 : f32 to vector<16x1xf32>
      %57 = arith.mulf %56, %53 : vector<16x1xf32>
      %58 = arith.addf %55, %57 : vector<16x1xf32>
      %c0_i32_40 = arith.constant 0 : i32
      %59 = vector.broadcast %c0_i32_40 : i32 to vector<16x1xi32>
      %60 = arith.cmpi sge, %9, %59 : vector<16x1xi32>
      %61 = arith.extui %60 : vector<16x1xi1> to vector<16x1xi32>
      %62 = arith.sitofp %61 : vector<16x1xi32> to vector<16x1xf32>
      %63 = arith.mulf %58, %62 : vector<16x1xf32>
      %64 = vector.shape_cast %63 : vector<16x1xf32> to vector<1x16x1xf32>
      %cst_41 = arith.constant dense<0.000000e+00> : vector<1xf32>
      %65 = vector.multi_reduction <add>, %64, %cst_41 [1, 2] : vector<1x16x1xf32> to vector<1xf32>
      %66 = vector.shape_cast %65 : vector<1xf32> to vector<1x1x1xf32>
      %67 = vector.extract %66[0, 0, 0] : f32 from vector<1x1x1xf32>
      %68 = vector.shape_cast %62 : vector<16x1xf32> to vector<1x16x1xf32>
      %cst_42 = arith.constant dense<0.000000e+00> : vector<1xf32>
      %69 = vector.multi_reduction <add>, %68, %cst_42 [1, 2] : vector<1x16x1xf32> to vector<1xf32>
      %70 = vector.shape_cast %69 : vector<1xf32> to vector<1x1x1xf32>
      %71 = vector.extract %70[0, 0, 0] : f32 from vector<1x1x1xf32>
      %72 = tpu.iota {dimensions = array<i32: 1>} : vector<8x128xi32>
      %c0_43 = arith.constant 0 : index
      %c0_44 = arith.constant 0 : index
      %73 = vector.load %arg4[%c0_43, %c0_44] : memref<8x128xf32, #tpu.memory_space<vmem>>, vector<8x128xf32>
      %c0_i32_45 = arith.constant 0 : i32
      %74 = vector.broadcast %c0_i32_45 : i32 to vector<8x128xi32>
      %75 = arith.cmpi eq, %72, %74 : vector<8x128xi32>
      %c1_i32 = arith.constant 1 : i32
      %76 = vector.broadcast %c1_i32 : i32 to vector<8x128xi32>
      %77 = arith.cmpi eq, %72, %76 : vector<8x128xi32>
      %cst_46 = arith.constant 0.000000e+00 : f32
      %78 = vector.broadcast %71 : f32 to vector<8x128xf32>
      %79 = vector.broadcast %cst_46 : f32 to vector<8x128xf32>
      %80 = arith.select %77, %78, %79 : vector<8x128xi1>, vector<8x128xf32>
      %81 = vector.broadcast %67 : f32 to vector<8x128xf32>
      %82 = arith.select %75, %81, %80 : vector<8x128xi1>, vector<8x128xf32>
      %83 = arith.addf %73, %82 : vector<8x128xf32>
      %c0_47 = arith.constant 0 : index
      %c0_48 = arith.constant 0 : index
      %84 = vector.load %arg4[%c0_47, %c0_48] : memref<8x128xf32, #tpu.memory_space<vmem>>, vector<8x128xf32>
      tpu.vector_store %arg4[%c0_47, %c0_48], %83 {strides = array<i32>} : memref<8x128xf32, #tpu.memory_space<vmem>>, vector<8x128xf32>,
    } else {
    }
    return
  }
  func.func @transform_0(%arg0: i32, %arg1: i32) -> (i32, i32) {
    %c0_i32 = arith.constant 0 : i32
    return %arg0, %arg1 : i32, i32
  }
  func.func @transform_1(%arg0: i32, %arg1: i32) -> (i32, i32) {
    %c0_i32 = arith.constant 0 : i32
    %c0_i32_0 = arith.constant 0 : i32
    return %arg0, %c0_i32 : i32, i32
  }
  func.func @transform_2(%arg0: i32, %arg1: i32) -> (i32, i32) {
    %c0_i32 = arith.constant 0 : i32
    %c0_i32_0 = arith.constant 0 : i32
    %c0_i32_1 = arith.constant 0 : i32
    return %c0_i32, %c0_i32_0 : i32, i32
  }
}

</mosaic_0001>

<bundles_post_ra>
// kernel: crystal_criterions_forward.1
= control target key start
LH: loop header
LB: loop body
LE: loop exit
PB: predicated region body
PF: predicated region fallthrough
CT: control target
= control target key end

     0   :  { %vm38_vm0 = vcmask 261120   ;;  %vm21_vm1 = vcmask 7168   ;;  %v217_v2 = vmov -inf   ;;  %v218_v5 = vmov 0   ;;  %s300_s0 = inlined_call_operand.vmem [shape: f32[16,32], index: 0, kind: input, shape index: {}]   ;;  %s301_s1 = inlined_call_operand.vmem [shape: s32[16,1], index: 1, kind: input, shape index: {}]   ;;  %s302_s2 = inlined_call_operand.vmem [shape: f32[8,128], index: 2, kind: output, shape index: {}]  }
   0x1   :  { %v30_v0 = vld [vmem:[%s300_s0] sm:$0xff]  ;;  %v31_v1 = vld [vmem:[%s300_s0 + $0x8] sm:$0xff]  ;;  %22 = vst.msk [vmem:[#allocation2] sm:$0xff] %vm21_vm1, %v217_v2  ;;  %23 = vst.msk [vmem:[#allocation2 + $0x8] sm:$0xff] %vm21_vm1, %v217_v2  ;;  %203 = vset.pattern.permute.xlu1 %v218_v5  ;;  %204 = vset.pattern.permute.xlu0 %v218_v5  ;;  %v219_v6 = vmov 0.0   ;;  %v34_v24 = vlaneseq }
   0x2   :  { %v39_v3 = vsel %vm38_vm0, %v30_v0, -inf  ;;  %v42_v4 = vsel %vm38_vm0, %v31_v1, -inf  ;;  %24 = vst.msk [vmem:[#allocation3] sm:$0xff] %vm21_vm1, %v219_v6  ;;  %25 = vst.msk [vmem:[#allocation3 + $0x8] sm:$0xff] %vm21_vm1, %v219_v6  ;;  %v260_v7 = vld [vmem:[%s301_s1] sm:$0xff]  ;;  %v268_v16 = vld [vmem:[%s301_s1 + $0x8] sm:$0xff] }
   0x3   :  { %40 = vmax.xlane.f32.xlu0 %v39_v3  ;;  %26 = vst.msk [vmem:[#allocation4] sm:$0xff] %vm21_vm1, %v219_v6  ;;  %27 = vst.msk [vmem:[#allocation4 + $0x8] sm:$0xff] %vm21_vm1, %v219_v6  ;;  %v88_v17 = vsel %vm38_vm0, %v30_v0, 0.0  ;;  %v273_v28 = vand.u32 127, %v34_v24  ;;  %v91_v31 = vsel %vm38_vm0, %v31_v1, 0.0  ;;  %vm149_vm4 = vcmp.ge.s32.totalorder %v260_v7, 0 }
   0x4   :  { %28 = vst.msk [vmem:[#allocation5] sm:$0xff] %vm21_vm1, %v219_v6  ;;  %29 = vst.msk [vmem:[#allocation5 + $0x8] sm:$0xff] %vm21_vm1, %v219_v6  ;;  %vm150_vm5 = vcmp.ge.s32.totalorder %v268_v16, 0 }
   0x5   :  { %vm183_vm6 = vcmp.eq.s32.totalorder %v273_v28, 1  ;;  %vm182_vm7 = vcmp.eq.s32.totalorder %v273_v28, 0 }
   0x7   :  { %43 = vmax.xlane.f32.xlu0 %v42_v4 }
   0x8   :  { %v36_v8 = vld [vmem:[#allocation2] sm:$0xff]  ;;  %v37_v11 = vld [vmem:[#allocation2 + $0x8] sm:$0xff] }
   0x9   :  { %v75_v43 = vld [vmem:[#allocation3] sm:$0xff]  ;;  %v76_v47 = vld [vmem:[#allocation3 + $0x8] sm:$0xff] }
   0xa   :  { %v86_v37 = vld [vmem:[#allocation4] sm:$0xff]  ;;  %v87_v52 = vld [vmem:[#allocation4 + $0x8] sm:$0xff] }
   0xb   :  { %v98_v55 = vld [vmem:[#allocation5] sm:$0xff]  ;;  %v99_v59 = vld [vmem:[#allocation5 + $0x8] sm:$0xff] }
  0x1d   :  { %101 = vperm.xlu0 %204, %v260_v7  }
  0x3c   :  { %89 = vadd.xlane.f32.xlu0 %v88_v17 }
  0x90   :  { %v41_v9 = vpop.xlane.xlu0 %40 }
  0x91   :  { %v45_v10 = vmax.f32 %v36_v8, %v41_v9 }
  0x93   :  { %v47_v12 = vsub.f32 %v36_v8, %v45_v10  ;;  %84 = vst.msk [vmem:[#allocation2] sm:$0xff] %vm21_vm1, %v45_v10  ;;  %55 = vperm.xlu1 %203, %v45_v10  }
  0x94   :  { %v44_v13 = vpop.xlane.xlu0 %43 }
  0x95   :  { %v46_v14 = vmax.f32 %v37_v11, %v44_v13  ;;  %v49_v40 = vmul.f32 1.442695, %v47_v12 }
  0x97   :  { %v48_v15 = vsub.f32 %v37_v11, %v46_v14  ;;  %85 = vst.msk [vmem:[#allocation2 + $0x8] sm:$0xff] %vm21_vm1, %v46_v14  ;;  %60 = vperm.xlu1 %203, %v46_v14  }
  0x99   :  { %v51_v41 = vmul.f32 1.442695, %v48_v15 }
  0x9a   :  { %v123_v3 = vld [vmem:[#allocation2] sm:$0xff] }
  0x9b   :  { %104 = vperm.xlu1 %203, %v268_v16  }
  0x9c   :  { %v102_v27 = vpop.permute.xlu0 %101 }
  0x9d   :  { %vm106_vm2 = vcmp.eq.s32.totalorder %v273_v28, %v102_v27 }
  0x9e   :  { %v108_v33 = vsel %vm106_vm2, %v30_v0, 0.0  ;;  %v124_v13 = vld [vmem:[#allocation2 + $0x8] sm:$0xff] }
  0x9f   :  { %v110_v34 = vsel %vm38_vm0, %v108_v33, 0.0 }
  0xc9   :  { %v90_v38 = vpop.xlane.xlu0 %89 }
  0xca   :  { %v94_v39 = vadd.f32 %v90_v38, %v86_v37 }
  0xcc   :  { %96 = vst.msk [vmem:[#allocation4] sm:$0xff] %vm21_vm1, %v94_v39 }
  0xd3   :  { %v137_v63 = vld [vmem:[#allocation4] sm:$0xff] }
  0xd4   :  { %v139_v2 = vmul.f32 0.03125, %v137_v63 }
 0x112   :  { %v56_v18 = vpop.permute.xlu1 %55 }
 0x113   :  { %v63_v19 = vsub.f32 %v30_v0, %v56_v18 }
 0x115   :  { %v65_v20 = vmul.f32 1.442695, %v63_v19 }
 0x116   :  { %v61_v21 = vpop.permute.xlu1 %60 }
 0x117   :  { %205 = vpow2.f32 %v65_v20  ;;  %v64_v22 = vsub.f32 %v31_v1, %v61_v21 }
 0x119   :  { %v67_v23 = vmul.f32 1.442695, %v64_v22 }
 0x11a   :  { %v105_v32 = vpop.permute.xlu1 %104 }
 0x11b   :  { %207 = vpow2.f32 %v67_v23  ;;  %vm107_vm3 = vcmp.eq.s32.totalorder %v273_v28, %v105_v32  ;;  %v194_v23 = vsel %vm149_vm4, 1.0, %v219_v6 }
 0x11c   :  { %v109_v35 = vsel %vm107_vm3, %v31_v1, 0.0  ;;  %209 = vpow2.f32 %v49_v40  ;;  %v169_v32 = vsel %vm21_vm1, %v194_v23, 0.0 }
 0x11d   :  { %v113_v36 = vsel %vm38_vm0, %v109_v35, 0.0  ;;  %211 = vpow2.f32 %v51_v41 }
 0x121   :  { %v206_v25 = vpop.eup %205 }
 0x122   :  { %v69_v26 = vsel %vm38_vm0, %v206_v25, 0.0 }
 0x123   :  { %70 = vadd.xlane.f32.xlu1 %v69_v26  ;;  %v195_v26 = vsel %vm150_vm5, 1.0, %v219_v6 }
 0x124   :  { %v170_v16 = vsel %vm21_vm1, %v195_v26, 0.0 }
 0x125   :  { %v208_v29 = vpop.eup %207 }
 0x126   :  { %v72_v30 = vsel %vm38_vm0, %v208_v29, 0.0  ;;  %v210_v42 = vpop.eup %209 }
 0x127   :  { %73 = vadd.xlane.f32.xlu1 %v72_v30  ;;  %v77_v44 = vmul.f32 %v210_v42, %v75_v43  ;;  %v212_v45 = vpop.eup %211 }
 0x128   :  { %v78_v49 = vmul.f32 %v212_v45, %v76_v47 }
 0x12b   :  { %92 = vadd.xlane.f32.xlu1 %v91_v31 }
 0x12f   :  { %111 = vadd.xlane.f32.xlu1 %v110_v34  ;;  %v171_v34 = vadd.f32 %v170_v16, %v169_v32 }
 0x133   :  { %114 = vadd.xlane.f32.xlu1 %v113_v36 }
 0x1b0   :  { %v71_v46 = vpop.xlane.xlu1 %70 }
 0x1b1   :  { %v79_v48 = vadd.f32 %v77_v44, %v71_v46 }
 0x1b3   :  { %82 = vst.msk [vmem:[#allocation3] sm:$0xff] %vm21_vm1, %v79_v48 }
 0x1b4   :  { %v74_v50 = vpop.xlane.xlu1 %73 }
 0x1b5   :  { %v80_v51 = vadd.f32 %v78_v49, %v74_v50 }
 0x1b7   :  { %83 = vst.msk [vmem:[#allocation3 + $0x8] sm:$0xff] %vm21_vm1, %v80_v51 }
 0x1b8   :  { %v93_v53 = vpop.xlane.xlu1 %92 }
 0x1b9   :  { %v95_v54 = vadd.f32 %v93_v53, %v87_v52 }
 0x1ba   :  { %v125_v56 = vld [vmem:[#allocation3] sm:$0xff] }
 0x1bb   :  { %97 = vst.msk [vmem:[#allocation4 + $0x8] sm:$0xff] %vm21_vm1, %v95_v54  ;;  %213 = vlog2.f32 %v125_v56 }
 0x1bc   :  { %v112_v57 = vpop.xlane.xlu1 %111 }
 0x1bd   :  { %v116_v58 = vadd.f32 %v112_v57, %v98_v55 }
 0x1be   :  { %v126_v60 = vld [vmem:[#allocation3 + $0x8] sm:$0xff] }
 0x1bf   :  { %118 = vst.msk [vmem:[#allocation5] sm:$0xff] %vm21_vm1, %v116_v58  ;;  %215 = vlog2.f32 %v126_v60 }
 0x1c0   :  { %v115_v61 = vpop.xlane.xlu1 %114 }
 0x1c1   :  { %v117_v62 = vadd.f32 %v115_v61, %v99_v59 }
 0x1c2   :  { %v138_v9 = vld [vmem:[#allocation4 + $0x8] sm:$0xff] }
 0x1c3   :  { %119 = vst.msk [vmem:[#allocation5 + $0x8] sm:$0xff] %vm21_vm1, %v117_v62  ;;  %v140_v15 = vmul.f32 0.03125, %v138_v9 }
 0x1c5   :  { %v214_v0 = vpop.eup %213 }
 0x1c6   :  { %v128_v1 = vmul.f32 0.6931472, %v214_v0  ;;  %v133_v4 = vld [vmem:[#allocation5] sm:$0xff] }
 0x1c8   :  { %v131_v5 = vadd.f32 %v128_v1, %v123_v3 }
 0x1c9   :  { %v216_v8 = vpop.eup %215 }
 0x1ca   :  { %v130_v10 = vmul.f32 0.6931472, %v216_v8  ;;  %v135_v11 = vsub.f32 %v131_v5, %v133_v4  ;;  %v141_v12 = vsub.f32 %v131_v5, %v139_v2  ;;  %v134_v19 = vld [vmem:[#allocation5 + $0x8] sm:$0xff] }
 0x1cc   :  { %v132_v14 = vadd.f32 %v130_v10, %v124_v13  ;;  %v143_v17 = vmul.f32 0.95, %v135_v11  ;;  %v145_v18 = vmul.f32 0.05, %v141_v12 }
 0x1ce   :  { %v136_v20 = vsub.f32 %v132_v14, %v134_v19  ;;  %v142_v21 = vsub.f32 %v132_v14, %v140_v15  ;;  %v147_v22 = vadd.f32 %v145_v18, %v143_v17 }
 0x1d0   :  { %v144_v24 = vmul.f32 0.95, %v136_v20  ;;  %v146_v25 = vmul.f32 0.05, %v142_v21  ;;  %v155_v29 = vmul.f32 %v194_v23, %v147_v22 }
 0x1d2   :  { %v148_v27 = vadd.f32 %v146_v25, %v144_v24  ;;  %v157_v30 = vsel %vm21_vm1, %v155_v29, 0.0 }
 0x1d4   :  { %v156_v7 = vmul.f32 %v195_v26, %v148_v27 }
 0x1d6   :  { %v158_v31 = vsel %vm21_vm1, %v156_v7, 0.0 }
 0x1d7   :  { %v159_v33 = vadd.f32 %v158_v31, %v157_v30 }
 0x1d9   :  { %160 = vadd.xlane.f32.xlu1 %v159_v33 }
 0x1dd   :  { %172 = vadd.xlane.f32.xlu1 %v171_v34 }
 0x266   :  { %v161_v35 = vpop.xlane.xlu1 %160 }
 0x267   :  { %v162_v36 = vrot.slane %v161_v35, 4 }
 0x269   :  { %v163_v37 = vadd.f32 %v162_v36, %v161_v35 }
 0x26a   :  { %v173_v38 = vpop.xlane.xlu1 %172 }
 0x26b   :  { %v164_v6 = vrot.slane %v163_v37, 2  ;;  %v174_v39 = vrot.slane %v173_v38, 4 }
 0x26d   :  { %v175_v40 = vadd.f32 %v174_v39, %v173_v38  ;;  %v165_v41 = vadd.f32 %v164_v6, %v163_v37 }
 0x26f   :  { %v176_v42 = vrot.slane %v175_v40, 2  ;;  %v166_v43 = vrot.slane %v165_v41, 1 }
 0x271   :  { %v177_v44 = vadd.f32 %v176_v42, %v175_v40  ;;  %v167_v45 = vadd.f32 %v166_v43, %v165_v41 }
 0x273   :  { %196 = vpush %v167_v45  ;;  %v178_v46 = vrot.slane %v177_v44, 1 }
 0x275   :  { %v179_v47 = vadd.f32 %v178_v46, %v177_v44 }
 0x277   :  { %198 = vpush %v179_v47 }
 0x2a4   :  { %s197_s1 = spop %196 }
 0x2a5   :  { %v186_v49 = vstv %s197_s1 }
 0x2a8   :  { %s199_s16 = spop %198 }
 0x2a9   :  { %v184_v48 = vstv %s199_s16 }
 0x2aa   :  { %v185_v50 = vsel %vm183_vm6, %v184_v48, 0.0 }
 0x2ab   :  { %v187_v51 = vsel %vm182_vm7, %v186_v49, %v185_v50 }
 0x2ac   :  { %189 = vst [vmem:[%s302_s2] sm:$0xff] %v187_v51 }

</bundles_post_ra>
